<compile_context>
chip_gen: v7x
topology: tpu7x:2x2x1
jax: 0.10.0
libtpu: 0.0.40
codegen_flags: <defaults>
</compile_context>

<pallas_src>
import functools

import jax
import jax.numpy as jnp
import numpy as np
from jax.experimental import pallas as pl
from jax.experimental.pallas import tpu as pltpu

LEAKY = 0.5


# --------------------------------------------------------------------------
# Kernels
# --------------------------------------------------------------------------
def gpn_kernel(x_ref, v_ref, vr_ref,
               wvb_ref, wxb_ref, wvt_ref, wxt_ref,
               bb_ref, bt_ref,
               spike_ref, vnew_ref):
    """General GPN_wo_FI step: arbitrary v / v_reset state."""
    x = x_ref[...]                       # [tile_n, C] f32
    v = v_ref[...]
    vr = vr_ref[...]

    x16 = x.astype(jnp.bfloat16)         # MXU operands in bf16, f32 accumulate
    v16 = v.astype(jnp.bfloat16)

    cc_b = (jnp.dot(v16, wvb_ref[...], preferred_element_type=jnp.float32)
            + jnp.dot(x16, wxb_ref[...], preferred_element_type=jnp.float32)
            + bb_ref[...])
    cc_t = (jnp.dot(v16, wvt_ref[...], preferred_element_type=jnp.float32)
            + jnp.dot(x16, wxt_ref[...], preferred_element_type=jnp.float32)
            + bt_ref[...])

    b_gate = jnp.tanh(cc_b)
    t_gate = jax.nn.sigmoid(cc_t)

    v_hidden = (1.0 - LEAKY) * v + LEAKY * x
    spike = (v_hidden - t_gate >= 0.0).astype(jnp.float32)

    spike_ref[...] = spike
    vnew_ref[...] = (1.0 - spike) * v_hidden + spike * vr + b_gate


def gpn_first_call_kernel(x_ref,
                          wxb_ref, wxt_ref,
                          bb_ref, bt_ref,
                          spike_ref, vnew_ref):
    """Eval-mode first call: v = v_reset = 0, so the v-matmuls and the
    spike*v_reset term vanish."""
    x = x_ref[...]
    x16 = x.astype(jnp.bfloat16)

    cc_b = (jnp.dot(x16, wxb_ref[...], preferred_element_type=jnp.float32)
            + bb_ref[...])
    cc_t = (jnp.dot(x16, wxt_ref[...], preferred_element_type=jnp.float32)
            + bt_ref[...])

    b_gate = jnp.tanh(cc_b)
    t_gate = jax.nn.sigmoid(cc_t)

    v_hidden = LEAKY * x
    spike = (v_hidden - t_gate >= 0.0).astype(jnp.float32)

    spike_ref[...] = spike
    vnew_ref[...] = (1.0 - spike) * v_hidden + b_gate


# --------------------------------------------------------------------------
# Wrappers
# --------------------------------------------------------------------------
def _split_params(w, bias, C):
    """PyTorch Linear weight [out=2C, in=2C] -> four bf16 [C, C] blocks + two
    f32 [1, C] bias rows.  Done in the wrapper (free layout plumbing) so every
    kernel tensor is lane-aligned and no concat / slice happens on-chip."""
    wt = jnp.asarray(w).T                     # [2C_in, 2C_out]
    w_vb = wt[:C, :C].astype(jnp.bfloat16)    # v -> cc_b
    w_xb = wt[C:, :C].astype(jnp.bfloat16)    # x -> cc_b
    w_vt = wt[:C, C:].astype(jnp.bfloat16)    # v -> cc_t
    w_xt = wt[C:, C:].astype(jnp.bfloat16)    # x -> cc_t
    bias = jnp.asarray(bias).reshape(-1)
    b_b = bias[:C].reshape(1, C).astype(jnp.float32)
    b_t = bias[C:].reshape(1, C).astype(jnp.float32)
    return w_vb, w_xb, w_vt, w_xt, b_b, b_t


def _pad_rows(arrs, n_pad, n):
    if n_pad == n:
        return arrs
    pad = ((0, n_pad - n), (0, 0))
    return [jnp.pad(a, pad) for a in arrs]


# NOTE: tile_n=512 hits the measured tile-size sweet spot on v5e/v6e (128 MiB
# VMEM).  On v7x (64 MiB VMEM) halve tile_n for large C, or raise
# vmem_limit_bytes via pltpu.CompilerParams.
def gpn_wo_fi_forward(x, v, v_reset, w, bias, *, tile_n=512):
    """General GPN_wo_FI step. Returns (spike, v_new)."""
    N, C = x.shape
    w_vb, w_xb, w_vt, w_xt, b_b, b_t = _split_params(w, bias, C)

    tile_n = min(tile_n, N)
    n_pad = pl.cdiv(N, tile_n) * tile_n
    x, v, v_reset = _pad_rows([x, v, v_reset], n_pad, N)
    grid = (n_pad // tile_n,)

    row = pl.BlockSpec((tile_n, C), lambda i: (i, 0))
    wspec = pl.BlockSpec((C, C), lambda i: (0, 0))     # weights stay resident
    bspec = pl.BlockSpec((1, C), lambda i: (0, 0))

    cost = pl.CostEstimate(
        flops=8 * n_pad * C * C,
        transcendentals=2 * n_pad * C,
        bytes_accessed=5 * n_pad * C * 4 + 4 * C * C * 2 + 2 * C * 4,
    )

    spike, v_new = pl.pallas_call(
        gpn_kernel,
        grid=grid,
        in_specs=[row, row, row, wspec, wspec, wspec, wspec, bspec, bspec],
        out_specs=[row, row],
        out_shape=[jax.ShapeDtypeStruct((n_pad, C), jnp.float32),
                   jax.ShapeDtypeStruct((n_pad, C), jnp.float32)],
        compiler_params=pltpu.CompilerParams(
            dimension_semantics=("parallel",)),
        cost_estimate=cost,
    )(x, v, v_reset, w_vb, w_xb, w_vt, w_xt, b_b, b_t)

    if n_pad != N:
        spike, v_new = spike[:N], v_new[:N]
    return spike, v_new


def gpn_wo_fi_first_call_eval(x, w, bias, *, tile_n=512):
    """Eval-mode first call (v = v_reset = spike = 0). Returns (spike, v_new)."""
    N, C = x.shape
    _, w_xb, _, w_xt, b_b, b_t = _split_params(w, bias, C)

    tile_n = min(tile_n, N)
    n_pad = pl.cdiv(N, tile_n) * tile_n
    (x,) = _pad_rows([x], n_pad, N)
    grid = (n_pad // tile_n,)

    row = pl.BlockSpec((tile_n, C), lambda i: (i, 0))
    wspec = pl.BlockSpec((C, C), lambda i: (0, 0))
    bspec = pl.BlockSpec((1, C), lambda i: (0, 0))

    cost = pl.CostEstimate(
        flops=4 * n_pad * C * C,
        transcendentals=2 * n_pad * C,
        bytes_accessed=3 * n_pad * C * 4 + 2 * C * C * 2 + 2 * C * 4,
    )

    spike, v_new = pl.pallas_call(
        gpn_first_call_kernel,
        grid=grid,
        in_specs=[row, wspec, wspec, bspec, bspec],
        out_specs=[row, row],
        out_shape=[jax.ShapeDtypeStruct((n_pad, C), jnp.float32),
                   jax.ShapeDtypeStruct((n_pad, C), jnp.float32)],
        compiler_params=pltpu.CompilerParams(
            dimension_semantics=("parallel",)),
        cost_estimate=cost,
    )(x, w_xb, w_xt, b_b, b_t)

    if n_pad != N:
        spike, v_new = spike[:N], v_new[:N]
    return spike, v_new


# --------------------------------------------------------------------------
# Pure-JAX reference (mirrors the kernel's bf16-matmul / f32-accumulate math)
# --------------------------------------------------------------------------
def reference_forward(x, v, v_reset, w, bias):
    N, C = x.shape
    wt = jnp.asarray(w).T
    w16 = wt.astype(jnp.bfloat16)
    bias = jnp.asarray(bias).reshape(-1)
    x16 = x.astype(jnp.bfloat16)
    v16 = v.astype(jnp.bfloat16)

    cc_b = (jnp.dot(v16, w16[:C, :C], preferred_element_type=jnp.float32)
            + jnp.dot(x16, w16[C:, :C], preferred_element_type=jnp.float32)
            + bias[:C])
    cc_t = (jnp.dot(v16, w16[:C, C:], preferred_element_type=jnp.float32)
            + jnp.dot(x16, w16[C:, C:], preferred_element_type=jnp.float32)
            + bias[C:])

    b_gate = jnp.tanh(cc_b)
    t_gate = jax.nn.sigmoid(cc_t)
    v_hidden = (1.0 - LEAKY) * v + LEAKY * x
    margin = v_hidden - t_gate
    spike = (margin >= 0.0).astype(jnp.float32)
    v_new = (1.0 - spike) * v_hidden + spike * v_reset + b_gate
    return spike, v_new, margin


def _check(spike, v_new, spike_ref, v_new_ref, margin_ref, name):
    spike = np.asarray(spike)
    v_new = np.asarray(v_new)
    spike_ref = np.asarray(spike_ref)
    v_new_ref = np.asarray(v_new_ref)
    margin = np.abs(np.asarray(margin_ref))

    # The heaviside threshold is a hard discontinuity; only require agreement
    # away from it (tiny EUP-vs-XLA sigmoid differences can flip exact ties).
    decisive = margin > 1e-3
    assert decisive.mean() > 0.99, f"{name}: too few decisive elements"
    np.testing.assert_array_equal(spike[decisive], spike_ref[decisive],
                                  err_msg=f"{name}: spike mismatch")
    agree = spike == spike_ref
    np.testing.assert_allclose(v_new[agree], v_new_ref[agree],
                               atol=2e-3, rtol=2e-3,
                               err_msg=f"{name}: v_new mismatch")


if __name__ == "__main__":
    # Module default input_channels = 128 -> Linear is 256 -> 256.
    # Small batch N = 256 with tile_n = 128 exercises a 2-step parallel grid.
    N, C = 256, 128
    key = jax.random.PRNGKey(0)
    kx, kw, kb, kv, kr = jax.random.split(key, 5)

    x = jax.random.normal(kx, (N, C), dtype=jnp.float32)
    # PyTorch nn.Linear weight layout: [out=2C, in=2C]; deterministic synthetic init.
    w = jax.random.normal(kw, (2 * C, 2 * C), dtype=jnp.float32) / np.sqrt(2 * C)
    bias = jax.random.normal(kb, (2 * C,), dtype=jnp.float32) * 0.01

    # ---- Path 1: eval-mode first call (v = v_reset = 0) — specialized kernel.
    spike1, vnew1 = gpn_wo_fi_first_call_eval(x, w, bias, tile_n=128)
    jax.block_until_ready((spike1, vnew1))
    zeros = jnp.zeros((N, C), jnp.float32)
    s_ref1, v_ref1, m_ref1 = reference_forward(x, zeros, zeros, w, bias)
    _check(spike1, vnew1, s_ref1, v_ref1, m_ref1, "first_call_eval")

    # ---- Path 2: general step with non-zero v / v_reset state.
    v_state = jax.random.normal(kv, (N, C), dtype=jnp.float32) * 0.3
    v_reset = jax.random.normal(kr, (N, C), dtype=jnp.float32) * 0.05
    spike2, vnew2 = gpn_wo_fi_forward(x, v_state, v_reset, w, bias, tile_n=128)
    jax.block_until_ready((spike2, vnew2))
    s_ref2, v_ref2, m_ref2 = reference_forward(x, v_state, v_reset, w, bias)
    _check(spike2, vnew2, s_ref2, v_ref2, m_ref2, "general_step")

    print("KERNEL_OK")
</pallas_src>

<mosaic_0001>
module attributes {stable_mosaic.version = 11 : i64} {
  func.func @gpn_first_call_kernel(%arg0: i32, %arg1: memref<128x128xf32, #tpu.memory_space<vmem>>, %arg2: memref<128x128xbf16, #tpu.memory_space<vmem>>, %arg3: memref<128x128xbf16, #tpu.memory_space<vmem>>, %arg4: memref<1x128xf32, #tpu.memory_space<vmem>>, %arg5: memref<1x128xf32, #tpu.memory_space<vmem>>, %arg6: memref<128x128xf32, #tpu.memory_space<vmem>>, %arg7: memref<128x128xf32, #tpu.memory_space<vmem>>) attributes {dimension_semantics = [#tpu.dimension_semantics<parallel>], iteration_bounds = array<i64: 2>, scalar_prefetch = 0 : i64, scratch_operands = 0 : i64, tpu.core_type = #tpu.core_type<tc>, window_params = [{transform_indices = @transform_0, window_bounds = array<i64: 128, 128>}, {pipeline_mode = #tpu.pipeline_mode<synchronous>, transform_indices = @transform_1, window_bounds = array<i64: 128, 128>}, {pipeline_mode = #tpu.pipeline_mode<synchronous>, transform_indices = @transform_2, window_bounds = array<i64: 128, 128>}, {pipeline_mode = #tpu.pipeline_mode<synchronous>, transform_indices = @transform_3, window_bounds = array<i64: 1, 128>}, {pipeline_mode = #tpu.pipeline_mode<synchronous>, transform_indices = @transform_4, window_bounds = array<i64: 1, 128>}, {transform_indices = @transform_5, window_bounds = array<i64: 128, 128>}, {transform_indices = @transform_6, window_bounds = array<i64: 128, 128>}]} {
    %c0 = arith.constant 0 : index
    %c0_0 = arith.constant 0 : index
    %0 = vector.load %arg1[%c0, %c0_0] : memref<128x128xf32, #tpu.memory_space<vmem>>, vector<128x128xf32>
    %1 = arith.truncf %0 : vector<128x128xf32> to vector<128x128xbf16>
    %c0_1 = arith.constant 0 : index
    %c0_2 = arith.constant 0 : index
    %2 = vector.load %arg2[%c0_1, %c0_2] : memref<128x128xbf16, #tpu.memory_space<vmem>>, vector<128x128xbf16>
    %cst = arith.constant dense<0.000000e+00> : vector<128x128xf32>
    %3 = tpu.matmul %1, %2, %cst {dimension_numbers = #tpu.dot_dimension_numbers<[1], [0], [0], [1], [0, 0, 1, 1], [], []>} : vector<128x128xbf16>, vector<128x128xbf16>, vector<128x128xf32> -> vector<128x128xf32>
    %c0_3 = arith.constant 0 : index
    %c0_4 = arith.constant 0 : index
    %4 = vector.load %arg4[%c0_3, %c0_4] : memref<1x128xf32, #tpu.memory_space<vmem>>, vector<1x128xf32>
    %5 = vector.broadcast %4 : vector<1x128xf32> to vector<128x128xf32>
    %6 = arith.addf %3, %5 : vector<128x128xf32>
    %c0_5 = arith.constant 0 : index
    %c0_6 = arith.constant 0 : index
    %7 = vector.load %arg3[%c0_5, %c0_6] : memref<128x128xbf16, #tpu.memory_space<vmem>>, vector<128x128xbf16>
    %cst_7 = arith.constant dense<0.000000e+00> : vector<128x128xf32>
    %8 = tpu.matmul %1, %7, %cst_7 {dimension_numbers = #tpu.dot_dimension_numbers<[1], [0], [0], [1], [0, 0, 1, 1], [], []>} : vector<128x128xbf16>, vector<128x128xbf16>, vector<128x128xf32> -> vector<128x128xf32>
    %c0_8 = arith.constant 0 : index
    %c0_9 = arith.constant 0 : index
    %9 = vector.load %arg5[%c0_8, %c0_9] : memref<1x128xf32, #tpu.memory_space<vmem>>, vector<1x128xf32>
    %10 = vector.broadcast %9 : vector<1x128xf32> to vector<128x128xf32>
    %11 = arith.addf %8, %10 : vector<128x128xf32>
    %12 = math.tanh %6 : vector<128x128xf32>
    %13 = arith.negf %11 : vector<128x128xf32>
    %14 = math.exp %13 : vector<128x128xf32>
    %cst_10 = arith.constant 1.000000e+00 : f32
    %15 = vector.broadcast %cst_10 : f32 to vector<128x128xf32>
    %16 = arith.addf %15, %14 : vector<128x128xf32>
    %17 = arith.divf %15, %16 : vector<128x128xf32>
    %cst_11 = arith.constant 5.000000e-01 : f32
    %18 = vector.broadcast %cst_11 : f32 to vector<128x128xf32>
    %19 = arith.mulf %18, %0 : vector<128x128xf32>
    %20 = arith.subf %19, %17 : vector<128x128xf32>
    %cst_12 = arith.constant 0.000000e+00 : f32
    %21 = vector.broadcast %cst_12 : f32 to vector<128x128xf32>
    %22 = arith.cmpf oge, %20, %21 : vector<128x128xf32>
    %23 = arith.extui %22 : vector<128x128xi1> to vector<128x128xi32>
    %24 = arith.sitofp %23 : vector<128x128xi32> to vector<128x128xf32>
    %c0_13 = arith.constant 0 : index
    %c0_14 = arith.constant 0 : index
    %25 = vector.load %arg6[%c0_13, %c0_14] : memref<128x128xf32, #tpu.memory_space<vmem>>, vector<128x128xf32>
    tpu.vector_store %arg6[%c0_13, %c0_14], %24 {strides = array<i32>} : memref<128x128xf32, #tpu.memory_space<vmem>>, vector<128x128xf32>,
    %cst_15 = arith.constant 1.000000e+00 : f32
    %26 = vector.broadcast %cst_15 : f32 to vector<128x128xf32>
    %27 = arith.subf %26, %24 : vector<128x128xf32>
    %28 = arith.mulf %27, %19 : vector<128x128xf32>
    %29 = arith.addf %28, %12 : vector<128x128xf32>
    %c0_16 = arith.constant 0 : index
    %c0_17 = arith.constant 0 : index
    %30 = vector.load %arg7[%c0_16, %c0_17] : memref<128x128xf32, #tpu.memory_space<vmem>>, vector<128x128xf32>
    tpu.vector_store %arg7[%c0_16, %c0_17], %29 {strides = array<i32>} : memref<128x128xf32, #tpu.memory_space<vmem>>, vector<128x128xf32>,
    return
  }
  func.func @transform_0(%arg0: i32) -> (i32, i32) {
    %c0_i32 = arith.constant 0 : i32
    %c0_i32_0 = arith.constant 0 : i32
    return %arg0, %c0_i32 : i32, i32
  }
  func.func @transform_1(%arg0: i32) -> (i32, i32) {
    %c0_i32 = arith.constant 0 : i32
    %c0_i32_0 = arith.constant 0 : i32
    %c0_i32_1 = arith.constant 0 : i32
    return %c0_i32, %c0_i32_0 : i32, i32
  }
  func.func @transform_2(%arg0: i32) -> (i32, i32) {
    %c0_i32 = arith.constant 0 : i32
    %c0_i32_0 = arith.constant 0 : i32
    %c0_i32_1 = arith.constant 0 : i32
    return %c0_i32, %c0_i32_0 : i32, i32
  }
  func.func @transform_3(%arg0: i32) -> (i32, i32) {
    %c0_i32 = arith.constant 0 : i32
    %c0_i32_0 = arith.constant 0 : i32
    %c0_i32_1 = arith.constant 0 : i32
    return %c0_i32, %c0_i32_0 : i32, i32
  }
  func.func @transform_4(%arg0: i32) -> (i32, i32) {
    %c0_i32 = arith.constant 0 : i32
    %c0_i32_0 = arith.constant 0 : i32
    %c0_i32_1 = arith.constant 0 : i32
    return %c0_i32, %c0_i32_0 : i32, i32
  }
  func.func @transform_5(%arg0: i32) -> (i32, i32) {
    %c0_i32 = arith.constant 0 : i32
    %c0_i32_0 = arith.constant 0 : i32
    return %arg0, %c0_i32 : i32, i32
  }
  func.func @transform_6(%arg0: i32) -> (i32, i32) {
    %c0_i32 = arith.constant 0 : i32
    %c0_i32_0 = arith.constant 0 : i32
    return %arg0, %c0_i32 : i32, i32
  }
}

</mosaic_0001>

<bundles_post_ra>
// kernel: tpu_custom_call.1
= control target key start
LH: loop header
LB: loop body
LE: loop exit
PB: predicated region body
PF: predicated region fallthrough
CT: control target
= control target key end

     0   :  { %12 = vsyncpa [#allocation3], 0  ;;  %s2288_s0 = inlined_call_operand.hbm [shape: f32[256,128], index: 0, kind: input, shape index: {}]   ;;  %s2289_s1 = inlined_call_operand.hbm [shape: bf16[128,128], index: 1, kind: input, shape index: {}]   ;;  %s2290_s2 = inlined_call_operand.hbm [shape: bf16[128,128], index: 2, kind: input, shape index: {}]   ;;  %s2291_s3 = inlined_call_operand.vmem [shape: f32[1,128], index: 3, kind: input, shape index: {}]   ;;  %s2292_s4 = inlined_call_operand.vmem [shape: f32[1,128], index: 4, kind: input, shape index: {}]   ;;  %s2293_s5 = inlined_call_operand.hbm [shape: f32[256,128], index: 5, kind: output, shape index: {0}]   ;;  %s2294_s6 = inlined_call_operand.hbm [shape: f32[256,128], index: 6, kind: output, shape index: {1}]  }
   0x1   :  { %14 = vsyncpa [#allocation3 + $0x1], 0 }
   0x2   :  { %15 = vsyncpa [#allocation6], 0 }
   0x3   :  { %16 = vsyncpa [#allocation4], 0 }
   0x4   :  { %18 = vsyncpa [#allocation4 + $0x1], 0 }
   0x5   :  { %19 = vsyncpa [#allocation10], 0 }
   0x6   :  { %21 = vsyncpa [#allocation10 + $0x1], 0  ;;  %s1704_s21 = smov 0   ;;  %s1706_s22 = smov 0  }
   0x7   :  { %s1708_s23 = smov 0   ;;  %s1710_s24 = smov 0  }
   0x8 LB: > { %s1725_s25 = sadd.s32 4294967295, %s1655_s24   ;;  %s1105_s26 = sadd.s32 4294967294, %s1655_s24   ;;  %s1655_s24 = sphi %s1710_s24, %s2318_s24   ;;  %s1651_s23 = sphi %s1708_s23, %s2317_s23   ;;  %s1647_s22 = sphi %s1706_s22, %s2316_s22   ;;  %s1643_s21 = sphi %s1704_s21, %s2315_s21  }
   0x9   : > { %p47_p0 = scmp.ne.s32.totalorder %s1647_s22, %s1643_s21  ;;  %p2295_p1 = scmp.eq.s32.totalorder %s1725_s25, 0 }
   0xa   : > { %p161_p3 = scmp.eq.s32.totalorder %s1105_s26, 1  ;;  %p1106_p5 = scmp.ge.s32.totalorder %s1655_s24, 1 }
   0xb   : > { %p1734_p4 = por %p2295_p1, %p47_p0  ;;  %p194_p7 = scmp.lt.s32.totalorder %s1655_s24, 3 }
   0xc   : > { %p1739_p6 = por %p161_p3, %p47_p0  ;;  %s1657_s30 = smov [#allocation5]  }
   0xd   : > { %s2298_s27 = scalar_select %p1734_p4, 1, 0 }
   0xe   : > { %s2299_s28 = scalar_select %p1739_p6, 1, 0 }
   0xf   : > { %p1744_p8 = pnand %p1106_p5, %p194_p7  ;;  %s206_s7 = sshll.u32 %s1657_s30, 4  ;;  %s1748_s7 = int_to_ptr.vmem [resolvable:$true] %s206_s7 }
  0x10   : > { %s1658_s9 = smov [#allocation7]   ;;  %s1467_s13 = scalar_lea.hbm %s2289_s1, 1024 }
  0x11   : > { %p1290_p9 = pneg %p1744_p8  ;;  %s219_s10 = sshll.u32 %s1658_s9, 4  ;;  %s1759_s10 = int_to_ptr.vmem [resolvable:$true] %s219_s10 }
  0x12   : > { %p1468_p12 = scmp.ne.s32.totalorder %s2289_s1, %s1467_s13  ;;  %p1474_p5 = scmp.lt.u32.totalorder %s1467_s13, %s2289_s1 }
  0x13   : > { %p1755_p11 = pnand %p1290_p9, %p2295_p1 }
  0x15   : > { %p1469_p13 = pneg %p1755_p11 }
  0x17   : > { %p1470_p0 = pnand %p1469_p13, %p1468_p12 }
  0x19   : > { %p1471_p3 = pneg %p1470_p0 }
  0x1b   : > { %p1476_p7 = pnand %p1474_p5, %p1471_p3 }
  0x1d   : > { %1479 = shalt.err (!%p1476_p7)
}
  0x1e   : > { %s1480_s18 = scalar_lea.vmem %s1748_s7, 1024  ;;  %p1488_p2 = scmp.lt.s32.totalorder %s1748_s7, %s1748_s7 }
  0x1f   : > { %p1481_p9 = scmp.ne.s32.totalorder %s1748_s7, %s1480_s18  ;;  %p1489_p12 = scmp.lt.s32.totalorder %s1480_s18, %s1480_s18 }
  0x21   : > { %p1483_p10 = pnand %p1481_p9, %p1469_p13  ;;  %p1490_p0 = por %p1489_p12, %p1488_p2 }
  0x23   : > { %p1484_p1 = pneg %p1483_p10 }
  0x25   : > { %p1491_p6 = pnand %p1490_p0, %p1484_p1 }
  0x27   : > { %1494 = shalt.err (!%p1491_p6)
}
  0x28   : > { %s1659_s19 = smov 64   ;;  %s1660_s20 = smov 4  }
  0x29   : > { %1293 = dma.hbm_to_vmem [thread:$0]  (!%p1755_p11), %s2289_s1, 1024, %s1748_s7, [#allocation6], %s1659_s19, %s1659_s19, %s1660_s20  }
  0x2a   : > { %s1495_s12 = scalar_lea.hbm %s2290_s2, 1024 }
  0x2b   : > { %p1496_p2 = scmp.ne.s32.totalorder %s2290_s2, %s1495_s12  ;;  %p1502_p10 = scmp.lt.u32.totalorder %s1495_s12, %s2290_s2 }
  0x2d   : > { %p1498_p1 = pnand %p1496_p2, %p1469_p13 }
  0x2f   : > { %p1499_p6 = pneg %p1498_p1 }
  0x31   : > { %p1504_p3 = pnand %p1502_p10, %p1499_p6 }
  0x33   : > { %1507 = shalt.err (!%p1504_p3)
}
  0x34   : > { %s1508_s7 = scalar_lea.vmem %s1759_s10, 1024  ;;  %p1516_p12 = scmp.lt.s32.totalorder %s1759_s10, %s1759_s10 }
  0x35   : > { %p1509_p5 = scmp.ne.s32.totalorder %s1759_s10, %s1508_s7  ;;  %p1517_p0 = scmp.lt.s32.totalorder %s1508_s7, %s1508_s7 }
  0x37   : > { %p1511_p7 = pnand %p1509_p5, %p1469_p13  ;;  %p1518_p2 = por %p1517_p0, %p1516_p12 }
  0x39   : > { %p1512_p9 = pneg %p1511_p7 }
  0x3b   : > { %p1519_p1 = pnand %p1518_p2, %p1512_p9 }
  0x3d   : > { %1522 = shalt.err (!%p1519_p1)
}
  0x3e   : > { %1296 = dma.hbm_to_vmem [thread:$0]  (!%p1755_p11), %s2290_s2, 1024, %s1759_s10, [#allocation6], %s1659_s19, %s1659_s19, %s1660_s20  }
  0x3f   : > { %s1814_s26 = sadd.s32 1, %s1655_s24   ;;  %s34_s8 = sadd.s32 1, %s1651_s23 }
  0x40   : > { %s31_s30 = ssub.s32 %s1655_s24, %s1814_s26  ;;  %p41_p13 = scmp.ne.s32.totalorder %s1651_s23, %s1647_s22 }
  0x41   : > { %p32_p6 = scmp.eq.s32.totalorder %s31_s30, 0  ;;  %p42_p10 = scmp.eq.s32.totalorder %s1655_s24, 0 }
  0x42   : > { %p2302_p3 = scmp.eq.s32.totalorder %s1725_s25, 1  ;;  %p1310_p7 = scmp.lt.s32.totalorder %s1655_s24, 2 }
  0x43   : > { %s1830_s11 = scalar_select %p32_p6, %s1651_s23, %s34_s8  }
  0x44   : > { %p1824_p5 = por %p2302_p3, %p41_p13  ;;  %p43_p9 = por %p42_p10, %p41_p13 }
  0x45   : > { %s239_s12 = sand.u32 1, %s1651_s23   ;;  %s1177_s10 = sshll.u32 %s1655_s24, 11 }
  0x46   : > { %s2303_s9 = scalar_select %p1824_p5, 1, 0 }
  0x47   : > { %s1110_s13 = sshll.u32 %s239_s12, 7  ;;  %s1837_s14 = scalar_lea.hbm %s2288_s0, %s1177_s10 }
  0x48   : > { %s243_s15 = scalar_lea.vmem [#allocation2], %s1110_s13  ;;  %p1841_p11 = pnand %p1310_p7, %p43_p9 }
  0x49   : > { %s250_s16 = sshll.u32 %s243_s15, 4  ;;  %s1845_s17 = scalar_lea.sflag [#allocation3], %s239_s12  ;;  %s1839_s16 = int_to_ptr.vmem [resolvable:$true] %s250_s16 }
  0x4a   : > { %s1523_s18 = scalar_lea.hbm %s1837_s14, 2048  ;;  %p1525_p0 = pneg %p1841_p11 }
  0x4b   : > { %p1524_p12 = scmp.ne.s32.totalorder %s1837_s14, %s1523_s18  ;;  %s1528_s13 = scalar_lea.hbm %s2288_s0, 4096 }
  0x4c   : > { %p1529_p13 = scmp.lt.u32.totalorder %s1837_s14, %s2288_s0  ;;  %p1530_p6 = scmp.lt.u32.totalorder %s1528_s13, %s1523_s18 }
  0x4d   : > { %p1526_p2 = pnand %p1525_p0, %p1524_p12  ;;  %p1532_p3 = scmp.lt.u32.totalorder %s1523_s18, %s1837_s14 }
  0x4e   : > { %p1531_p10 = por %p1530_p6, %p1529_p13 }
  0x4f   : > { %p1527_p1 = pneg %p1526_p2 }
  0x50   : > { %p1533_p7 = por %p1532_p3, %p1531_p10 }
  0x52   : > { %p1534_p9 = pnand %p1533_p7, %p1527_p1 }
  0x54   : > { %1537 = shalt.err (!%p1534_p9)
}
  0x55   : > { %s1538_s12 = scalar_lea.vmem %s1839_s16, 2048  ;;  %s1661_s20 = smov [#allocation2]  }
  0x56   : > { %p1539_p12 = scmp.ne.s32.totalorder %s1839_s16, %s1538_s12  ;;  %s1543_s15 = sshll.u32 %s1661_s20, 4  ;;  %s1544_s15 = int_to_ptr.vmem [resolvable:$false] %s1543_s15 }
  0x57   : > { %s1545_s8 = scalar_lea.vmem %s1544_s15, 4096  ;;  %p1546_p4 = scmp.lt.s32.totalorder %s1839_s16, %s1544_s15 }
  0x58   : > { %p1541_p2 = pnand %p1539_p12, %p1525_p0  ;;  %p1547_p13 = scmp.lt.s32.totalorder %s1545_s8, %s1538_s12 }
  0x5a   : > { %p1542_p5 = pneg %p1541_p2  ;;  %p1548_p6 = por %p1547_p13, %p1546_p4 }
  0x5c   : > { %p1549_p10 = pnand %p1548_p6, %p1542_p5 }
  0x5e   : > { %1552 = shalt.err (!%p1549_p10)
}
  0x5f   : > { %s1662_s18 = smov 128   ;;  %s1663_s30 = smov 8  }
  0x60   : > { %1300 = dma.hbm_to_vmem [thread:$0]  (!%p1841_p11), %s1837_s14, 2048, %s1839_s16, %s1845_s17, %s1662_s18, %s1662_s18, %s1663_s30  }
  0x61   : > { %262 = sbr.rel (%p1744_p8) target bundleno = 458 (0x1ca), region = 40  ;;  %s1876_s13 = sand.u32 (!%p1744_p8), 1, %s1647_s22  }
  0x62   : > { %s1879_s10 = sshll.u32 (!%p1744_p8), %s1876_s13, 7  ;;  %s265_s19 = scalar_lea.sflag (!%p1744_p8), [#allocation3], %s1876_s13 }
  0x63   : > { %s1883_s12 = scalar_lea.vmem (!%p1744_p8), [#allocation2], %s1879_s10  ;;  %p2305_p4 = scmp.ne.s32.totalorder (!%p1744_p8), %s2298_s27, 0 }
  0x68   : > { %1626 = dma.done.wait (%p2305_p4), %s265_s19, 2048  }
  0x69   : > { %1628 = vsyncadd (%p2305_p4), %s265_s19, 4294965248  ;;  %p2306_p5 = scmp.eq.s32.totalorder %s1725_s25, 0 }
  0x6b   : > { %1630 = dma.done.wait (%p2306_p5), [#allocation6], 2048   ;;  %p2307_p8 = pmov %p2306_p5 }
  0x6c   : > { %v1355_v0 = vld [vmem:[#allocation7] sm:$0xff]   ;;  %v1356_v1 = vld [vmem:[#allocation7 + $0x8] sm:$0xff]   ;;  %v1357_v2 = vld [vmem:[#allocation7 + $0x10] sm:$0xff]   ;;  %s2078_s7 = scalar_lea.vmem [#allocation8], %s1879_s10  ;;  %s2096_s17 = scalar_lea.vmem [#allocation9], %s1879_s10 }
  0x6d   : > { %1632 = vsyncadd (%p2307_p8), [#allocation6], 4294965248  ;;  %1244 = vmatprep.subr.bf16.mxu1 %v1355_v0  ;;  %v1360_v3 = vld [vmem:[#allocation5] sm:$0xff]   ;;  %v1362_v4 = vld [vmem:[#allocation5 + $0x8] sm:$0xff]   ;;  %s1178_s20 = sshll.u32 %s1725_s25, 11  ;;  %s965_s15 = sshll.u32 %s2078_s7, 4  ;;  %s2194_s15 = int_to_ptr.vmem [resolvable:$true] %s965_s15 }
  0x6e   : > { %1245 = vmatpush3.bf16.msra.mxu1 %v1355_v0  ;;  %1212 = vmatprep.subr.bf16.mxu0 %v1360_v3  ;;  %v1358_v5 = vld [vmem:[#allocation7 + $0x18] sm:$0xff]   ;;  %v1364_v6 = vld [vmem:[#allocation5 + $0x10] sm:$0xff]   ;;  %v1894_v7 = vld [vmem:[%s1883_s12] sm:$0xff]  ;;  %s2192_s30 = scalar_lea.hbm %s2293_s5, %s1178_s20  ;;  %s981_s10 = sshll.u32 %s2096_s17, 4  ;;  %s2240_s10 = int_to_ptr.vmem [resolvable:$true] %s981_s10 }
  0x6f   : > { %1246 = vmatprep.subr.bf16.mxu1 %v1356_v1  ;;  %1213 = vmatpush3.bf16.msra.mxu0 %v1360_v3  ;;  %v1897_v8 = vld [vmem:[%s1883_s12 + $0x8] sm:$0xff]  ;;  %v1359_v9 = vld [vmem:[#allocation7 + $0x20] sm:$0xff]   ;;  %v1366_v11 = vld [vmem:[#allocation5 + $0x18] sm:$0xff]   ;;  %s947_s19 = scalar_lea.sflag [#allocation4], %s1876_s13  ;;  %p2312_p0 = scmp.ne.s32.totalorder %s2303_s9, 0 }
  0x70   : > { %1214 = vmatprep.subr.bf16.mxu0 %v1362_v4  ;;  %v330_v10 = vpack.c.bf16 %v1897_v8, %v1894_v7  ;;  %v1361_v12 = vld [vmem:[#allocation7 + $0x28] sm:$0xff]   ;;  %v1367_v13 = vld [vmem:[#allocation5 + $0x20] sm:$0xff]   ;;  %v1363_v14 = vld [vmem:[#allocation7 + $0x30] sm:$0xff]   ;;  %s1665_s27 = smov [#allocation8]  }
  0x71   : > { %v1368_v15 = vld [vmem:[#allocation5 + $0x28] sm:$0xff]   ;;  %v1365_v16 = vld [vmem:[#allocation7 + $0x38] sm:$0xff]   ;;  %v1369_v17 = vld [vmem:[#allocation5 + $0x30] sm:$0xff]   ;;  %s1557_s29 = sshll.u32 %s1665_s27, 4  ;;  %s1558_s29 = int_to_ptr.vmem [resolvable:$false] %s1557_s29 }
  0x72   : > { %1247 = vmatpush3.bf16.msra.mxu1 %v1356_v1  ;;  %1260 = vmatprep.mubr.bf16.mxu1 %v330_v10  ;;  %v1902_v18 = vld [vmem:[%s1883_s12 + $0x10] sm:$0xff]  ;;  %v1905_v19 = vld [vmem:[%s1883_s12 + $0x18] sm:$0xff]  ;;  %v1908_v20 = vld [vmem:[%s1883_s12 + $0x20] sm:$0xff]  ;;  %s1559_s14 = scalar_lea.vmem %s1558_s29, 4096  ;;  %p1560_p7 = scmp.lt.s32.totalorder %s2194_s15, %s1558_s29 }
  0x73   : > { %1248 = vmatprep.subr.bf16.mxu1 %v1357_v2  ;;  %1215 = vmatpush3.bf16.msra.mxu0 %v1362_v4  ;;  %v1911_v21 = vld [vmem:[%s1883_s12 + $0x28] sm:$0xff]  ;;  %v1370_v22 = vld [vmem:[#allocation5 + $0x38] sm:$0xff]   ;;  %v331_v23 = vpack.c.bf16 %v1905_v19, %v1902_v18  ;;  %v1918_v25 = vld [vmem:[%s1883_s12 + $0x30] sm:$0xff] }
  0x74   : > { %1216 = vmatprep.subr.bf16.mxu0 %v1364_v6  ;;  %1228 = vmatprep.mubr.bf16.mxu0 %v330_v10  ;;  %v332_v24 = vpack.c.bf16 %v1911_v21, %v1908_v20  ;;  %v1921_v26 = vld [vmem:[%s1883_s12 + $0x38] sm:$0xff]  ;;  %v1924_v27 = vld [vmem:[%s1883_s12 + $0x40] sm:$0xff]  ;;  %v1927_v28 = vld [vmem:[%s1883_s12 + $0x48] sm:$0xff] }
  0x75   : > { %v333_v29 = vpack.c.bf16 %v1921_v26, %v1918_v25  ;;  %v334_v30 = vpack.c.bf16 %v1927_v28, %v1924_v27  ;;  %v1934_v31 = vld [vmem:[%s1883_s12 + $0x50] sm:$0xff]  ;;  %v1937_v32 = vld [vmem:[%s1883_s12 + $0x58] sm:$0xff]  ;;  %v1940_v33 = vld [vmem:[%s1883_s12 + $0x60] sm:$0xff] }
  0x76   : > { %1249 = vmatpush3.bf16.msra.mxu1 %v1357_v2  ;;  %v1943_v34 = vld [vmem:[%s1883_s12 + $0x68] sm:$0xff]  ;;  %v335_v35 = vpack.c.bf16 %v1937_v32, %v1934_v31  ;;  %v1950_v37 = vld [vmem:[%s1883_s12 + $0x70] sm:$0xff]  ;;  %v1953_v38 = vld [vmem:[%s1883_s12 + $0x78] sm:$0xff]  ;;  %s1553_s12 = scalar_lea.vmem %s2194_s15, 2048 }
  0x77   : > { %1250 = vmatprep.subr.bf16.mxu1 %v1358_v5  ;;  %1217 = vmatpush3.bf16.msra.mxu0 %v1364_v6  ;;  %v336_v36 = vpack.c.bf16 %v1943_v34, %v1940_v33  ;;  %v337_v39 = vpack.c.bf16 %v1953_v38, %v1950_v37  ;;  %v1960_v40 = vld [vmem:[%s2292_s4] ss:$0 sm:$0xff]  ;;  %p1554_p11 = scmp.ne.s32.totalorder %s2194_s15, %s1553_s12  ;;  %p1561_p9 = scmp.lt.s32.totalorder %s1559_s14, %s1553_s12 }
  0x78   : > { %1218 = vmatprep.subr.bf16.mxu0 %v1366_v11  ;;  %v1968_v49 = vld [vmem:[%s2291_s3] ss:$0 sm:$0xff] }
  0x79   : > { %p1555_p1 = pnand %p1554_p11, %p2312_p0  ;;  %p1562_p12 = por %p1561_p9, %p1560_p7 }
  0x7a   : > { %1251 = vmatpush3.bf16.msra.mxu1 %v1358_v5 }
  0x7b   : > { %1252 = vmatprep.subr.bf16.mxu1 %v1359_v9  ;;  %1219 = vmatpush3.bf16.msra.mxu0 %v1366_v11  ;;  %p1556_p3 = pneg %p1555_p1 }
  0x7c   : > { %1220 = vmatprep.subr.bf16.mxu0 %v1367_v13 }
  0x7d   : > { %p1563_p2 = pnand %p1562_p12, %p1556_p3 }
  0x7e   : > { %1253 = vmatpush3.bf16.msra.mxu1 %v1359_v9 }
  0x7f   : > { %1254 = vmatprep.subr.bf16.mxu1 %v1361_v12  ;;  %1221 = vmatpush3.bf16.msra.mxu0 %v1367_v13 }
  0x80   : > { %1222 = vmatprep.subr.bf16.mxu0 %v1368_v15 }
  0x82   : > { %1255 = vmatpush3.bf16.msra.mxu1 %v1361_v12 }
  0x83   : > { %1256 = vmatprep.subr.bf16.mxu1 %v1363_v14  ;;  %1223 = vmatpush3.bf16.msra.mxu0 %v1368_v15 }
  0x84   : > { %1224 = vmatprep.subr.bf16.mxu0 %v1369_v17 }
  0x86   : > { %1257 = vmatpush3.bf16.msra.mxu1 %v1363_v14 }
  0x87   : > { %1258 = vmatprep.subr.bf16.mxu1 %v1365_v16  ;;  %1225 = vmatpush3.bf16.msra.mxu0 %v1369_v17  ;;  %v1984_v17 = vmul.f32 0.5, %v1897_v8  ;;  %v1996_v8 = vmul.f32 0.5, %v1911_v21 }
  0x88   : > { %1226 = vmatprep.subr.bf16.mxu0 %v1370_v22 }
  0x8a   : > { %1259 = vmatpush3.bf16.msra.mxu1 %v1365_v16  ;;  %v1981_v16 = vmul.f32 0.5, %v1894_v7 }
  0x8b   : > { %1227 = vmatpush3.bf16.msra.mxu0 %v1370_v22  ;;  %v1987_v22 = vmul.f32 0.5, %v1902_v18 }
  0x8d   : > { %1261 = vmatmul.mubr.bf16.vlgmr.msra.gmra.mrb[0].mxu1 %v331_v23 }
  0x8e   : > { %1264 = vmatprep.mubr.bf16.mxu1 %v332_v24  ;;  %1229 = vmatmul.mubr.bf16.vlgmr.msra.gmra.mrb[0].mxu0 %v331_v23 }
  0x8f   : > { %1232 = vmatprep.mubr.bf16.mxu0 %v332_v24 }
  0x95   : > { %1265 = vmatmul.mubr.bf16.gmra.mrb[4].mxu1 %v333_v29 }
  0x96   : > { %1268 = vmatprep.mubr.bf16.mxu1 %v334_v30  ;;  %1233 = vmatmul.mubr.bf16.gmra.mrb[4].mxu0 %v333_v29  ;;  %v1990_v29 = vmul.f32 0.5, %v1905_v19  ;;  %v2000_v19 = vmul.f32 0.5, %v1918_v25 }
  0x97   : > { %1236 = vmatprep.mubr.bf16.mxu0 %v334_v30  ;;  %v1993_v30 = vmul.f32 0.5, %v1908_v20 }
  0x9d   : > { %1269 = vmatmul.mubr.bf16.gmra.mrb[8].mxu1 %v335_v35 }
  0x9e   : > { %1272 = vmatprep.mubr.bf16.mxu1 %v336_v36  ;;  %1237 = vmatmul.mubr.bf16.gmra.mrb[8].mxu0 %v335_v35 }
  0x9f   : > { %1240 = vmatprep.mubr.bf16.mxu0 %v336_v36 }
  0xa5   : > { %1273 = vmatmul.mubr.bf16.gmra.mrb[12].mxu1 %v337_v39 }
  0xa6   : > { %1241 = vmatmul.mubr.bf16.gmra.mrb[12].mxu0 %v337_v39 }
 0x160   : > { %v1262_v41 = vpop.f32.mrb[0].mxu1 }
 0x161   : > { %v620_v42 = vadd.f32 %v1262_v41, %v1960_v40  ;;  %v611_v43 = vpop.f32.mrb[1].mxu1  ;;  %v1230_v53 = vpop.f32.mrb[0].mxu0 }
 0x162   : > { %v612_v44 = vadd.f32 %v1960_v40, %v611_v43  ;;  %v1263_v45 = vpop.f32.mrb[2].mxu1  ;;  %v452_v55 = vadd.f32 %v1230_v53, %v1968_v49  ;;  %v443_v56 = vpop.f32.mrb[1].mxu0 }
 0x163   : > { %v1139_v46 = vmul.f32 -1.442695, %v620_v42  ;;  %v623_v47 = vadd.f32 %v1263_v45, %v1960_v40  ;;  %v614_v48 = vpop.f32.mrb[3].mxu1  ;;  %v444_v57 = vadd.f32 %v1968_v49, %v443_v56  ;;  %v1231_v58 = vpop.f32.mrb[2].mxu0  ;;  %v2018_v56 = vmul.f32 0.5, %v1927_v28 }
 0x164   : > { %v1137_v50 = vmul.f32 -1.442695, %v612_v44  ;;  %v615_v51 = vadd.f32 %v1960_v40, %v614_v48  ;;  %v455_v60 = vadd.f32 %v1231_v58, %v1968_v49  ;;  %v446_v61 = vpop.f32.mrb[3].mxu0  ;;  %v2032_v28 = vmul.f32 0.5, %v1950_v37 }
 0x165   : > { %1371 = vpow2.f32 %v1139_v46  ;;  %v1140_v52 = vmul.f32 -1.442695, %v623_v47  ;;  %v447_v0 = vadd.f32 %v1968_v49, %v446_v61 }
 0x166   : > { %1373 = vpow2.f32 %v1137_v50  ;;  %v1138_v54 = vmul.f32 -1.442695, %v615_v51 }
 0x167   : > { %1375 = vpow2.f32 %v1140_v52  ;;  %v2009_v52 = vmul.f32 0.5, %v1921_v26  ;;  %v2023_v26 = vmul.f32 0.5, %v1934_v31 }
 0x168   : > { %1377 = vpow2.f32 %v1138_v54  ;;  %v1266_v59 = vpop.f32.mrb[4].mxu1 }
 0x169   : > { %v636_v62 = vadd.f32 %v1266_v59, %v1960_v40  ;;  %v627_v63 = vpop.f32.mrb[5].mxu1  ;;  %1379 = vtanh.f32 %v452_v55  ;;  %v1234_v11 = vpop.f32.mrb[4].mxu0  ;;  %v2015_v55 = vmul.f32 0.5, %v1924_v27  ;;  %v2029_v27 = vmul.f32 0.5, %v1940_v33 }
 0x16a   : > { %v628_v1 = vadd.f32 %v1960_v40, %v627_v63  ;;  %v1267_v2 = vpop.f32.mrb[6].mxu1  ;;  %1381 = vtanh.f32 %v444_v57  ;;  %v468_v13 = vadd.f32 %v1234_v11, %v1968_v49  ;;  %v459_v14 = vpop.f32.mrb[5].mxu0 }
 0x16b   : > { %v1143_v3 = vmul.f32 -1.442695, %v636_v62  ;;  %v639_v4 = vadd.f32 %v1267_v2, %v1960_v40  ;;  %v630_v5 = vpop.f32.mrb[7].mxu1  ;;  %1383 = vtanh.f32 %v455_v60  ;;  %v1235_v23 = vpop.f32.mrb[6].mxu0  ;;  %v2026_v60 = vmul.f32 0.5, %v1937_v32 }
 0x16c   : > { %v1141_v6 = vmul.f32 -1.442695, %v628_v1  ;;  %v631_v9 = vadd.f32 %v1960_v40, %v630_v5  ;;  %1385 = vtanh.f32 %v447_v0  ;;  %v462_v7 = vpop.f32.mrb[7].mxu0  ;;  %v2035_v0 = vmul.f32 0.5, %v1953_v38 }
 0x16d   : > { %1387 = vpow2.f32 %v1143_v3  ;;  %v1144_v10 = vmul.f32 -1.442695, %v639_v4  ;;  %v2038_v3 = vadd.f32 %v1968_v49, %v459_v14 }
 0x16e   : > { %1389 = vpow2.f32 %v1141_v6  ;;  %v1142_v12 = vmul.f32 -1.442695, %v631_v9  ;;  %v2042_v9 = vadd.f32 %v1235_v23, %v1968_v49 }
 0x16f   : > { %v1372_v15 = vpop.eup %1371  ;;  %1391 = vpow2.f32 %v1144_v10 }
 0x170   : > { %v1374_v24 = vpop.eup %1373  ;;  %v740_v35 = vadd.f32 1.0, %v1372_v15  ;;  %1393 = vpow2.f32 %v1142_v12  ;;  %v1270_v36 = vpop.f32.mrb[8].mxu1 }
 0x171   : > { %v1376_v39 = vpop.eup %1375  ;;  %v738_v41 = vadd.f32 1.0, %v1374_v24  ;;  %v652_v18 = vadd.f32 %v1270_v36, %v1960_v40  ;;  %v643_v42 = vpop.f32.mrb[9].mxu1  ;;  %1395 = vtanh.f32 %v468_v13  ;;  %v2046_v13 = vadd.f32 %v1968_v49, %v462_v7 }
 0x172   : > { %v1378_v43 = vpop.eup %1377  ;;  %1397 = vrcp.f32 %v740_v35  ;;  %v741_v20 = vadd.f32 1.0, %v1376_v39  ;;  %v644_v44 = vadd.f32 %v1960_v40, %v643_v42  ;;  %v1271_v45 = vpop.f32.mrb[10].mxu1 }
 0x173   : > { %v2003_v46 = vpop.eup %1379  ;;  %1399 = vrcp.f32 %v738_v41  ;;  %v739_v47 = vadd.f32 1.0, %v1378_v43  ;;  %v1147_v21 = vmul.f32 -1.442695, %v652_v18  ;;  %v655_v48 = vadd.f32 %v1271_v45, %v1960_v40  ;;  %v646_v50 = vpop.f32.mrb[11].mxu1 }
 0x174   : > { %v2006_v51 = vpop.eup %1381  ;;  %1401 = vrcp.f32 %v741_v20  ;;  %v1145_v25 = vmul.f32 -1.442695, %v644_v44  ;;  %v647_v53 = vadd.f32 %v1960_v40, %v646_v50  ;;  %v1238_v58 = vpop.f32.mrb[8].mxu0 }
 0x175   : > { %v2012_v54 = vpop.eup %1383  ;;  %1403 = vrcp.f32 %v739_v47  ;;  %v1148_v57 = vmul.f32 -1.442695, %v655_v48  ;;  %v475_v62 = vpop.f32.mrb[9].mxu0  ;;  %v2053_v18 = vadd.f32 %v1238_v58, %v1968_v49 }
 0x176   : > { %v2020_v59 = vpop.eup %1385  ;;  %1405 = vpow2.f32 %v1147_v21  ;;  %v1146_v61 = vmul.f32 -1.442695, %v647_v53  ;;  %v1239_v1 = vpop.f32.mrb[10].mxu0  ;;  %v2057_v20 = vadd.f32 %v1968_v49, %v475_v62  ;;  %v1664_v62 = vmov 0.0  }
 0x177   : > { %v1388_v63 = vpop.eup %1387  ;;  %1407 = vpow2.f32 %v1145_v25  ;;  %v478_v4 = vpop.f32.mrb[11].mxu0  ;;  %v2063_v21 = vadd.f32 %v1239_v1, %v1968_v49 }
 0x178   : > { %v1390_v31 = vpop.eup %1389  ;;  %v744_v2 = vadd.f32 1.0, %v1388_v63  ;;  %1409 = vpow2.f32 %v1148_v57  ;;  %v1274_v32 = vpop.f32.mrb[12].mxu1 }
 0x179   : > { %v1392_v5 = vpop.eup %1391  ;;  %v742_v6 = vadd.f32 1.0, %v1390_v31  ;;  %1411 = vpow2.f32 %v1146_v61  ;;  %v668_v33 = vadd.f32 %v1274_v32, %v1960_v40  ;;  %v659_v37 = vpop.f32.mrb[13].mxu1 }
 0x17a   : > { %v1394_v38 = vpop.eup %1393  ;;  %1413 = vrcp.f32 %v744_v2  ;;  %v745_v10 = vadd.f32 1.0, %v1392_v5  ;;  %v660_v11 = vadd.f32 %v1960_v40, %v659_v37  ;;  %v1275_v12 = vpop.f32.mrb[14].mxu1 }
 0x17b   : > { %v2048_v14 = vpop.eup %1395  ;;  %1415 = vrcp.f32 %v742_v6  ;;  %v743_v15 = vadd.f32 1.0, %v1394_v38  ;;  %v1151_v24 = vmul.f32 -1.442695, %v668_v33  ;;  %v671_v35 = vadd.f32 %v1275_v12, %v1960_v40  ;;  %v662_v36 = vpop.f32.mrb[15].mxu1 }
 0x17c   : > { %v1398_v39 = vpop.eup %1397  ;;  %1417 = vrcp.f32 %v745_v10  ;;  %v1149_v23 = vmul.f32 -1.442695, %v660_v11  ;;  %v663_v41 = vadd.f32 %v1960_v40, %v662_v36  ;;  %v2059_v44 = vpop.f32.mrb[12].mxu0  ;;  %v2066_v40 = vadd.f32 %v1968_v49, %v478_v4 }
 0x17d   : > { %v1400_v42 = vpop.eup %1399  ;;  %v804_v7 = vsub.f32 %v1987_v22, %v1398_v39  ;;  %1419 = vrcp.f32 %v743_v15  ;;  %v1152_v43 = vmul.f32 -1.442695, %v671_v35  ;;  %v2068_v48 = vpop.f32.mrb[13].mxu0 }
 0x17e   : > { %v1402_v45 = vpop.eup %1401  ;;  %v802_v47 = vsub.f32 %v1981_v16, %v1400_v42  ;;  %1421 = vpow2.f32 %v1151_v24  ;;  %v1150_v53 = vmul.f32 -1.442695, %v663_v41  ;;  %v2071_v57 = vpop.f32.mrb[14].mxu0 }
 0x17f   : > { %v1404_v50 = vpop.eup %1403  ;;  %vm820_vm0 = vcmp.ge.f32.partialorder %v804_v7, 0.0  ;;  %v805_v25 = vsub.f32 %v1990_v29, %v1402_v45  ;;  %1423 = vpow2.f32 %v1149_v23  ;;  %v2075_v1 = vpop.f32.mrb[15].mxu0 }
 0x180   : > { %v1406_v58 = vpop.eup %1405  ;;  %vm818_vm1 = vcmp.ge.f32.partialorder %v802_v47, 0.0  ;;  %v803_v61 = vsub.f32 %v1984_v17, %v1404_v50  ;;  %v1155_v63 = vsel %vm820_vm0, 1.0, %v1664_v62  ;;  %1425 = vpow2.f32 %v1152_v43 }
 0x181   : > { %v1408_v31 = vpop.eup %1407  ;;  %vm821_vm2 = vcmp.ge.f32.partialorder %v805_v25, 0.0  ;;  %v748_v2 = vadd.f32 1.0, %v1406_v58  ;;  %868 = vst [vmem:[%s2078_s7 + $0x10] sm:$0xff] %v1155_v63  ;;  %v884_v32 = vsub.f32 1.0, %v1155_v63  ;;  %v1153_v4 = vsel %vm818_vm1, 1.0, %v1664_v62 }
 0x182   : > { %v1410_v5 = vpop.eup %1409  ;;  %vm819_vm3 = vcmp.ge.f32.partialorder %v803_v61, 0.0  ;;  %v746_v6 = vadd.f32 1.0, %v1408_v31  ;;  %866 = vst [vmem:[%s2078_s7] sm:$0xff] %v1153_v4  ;;  %v882_v33 = vsub.f32 1.0, %v1153_v4  ;;  %v1156_v37 = vsel %vm821_vm2, 1.0, %v1664_v62 }
 0x183   : > { %v1412_v38 = vpop.eup %1411  ;;  %1427 = vrcp.f32 %v748_v2  ;;  %v749_v10 = vadd.f32 1.0, %v1410_v5  ;;  %v900_v11 = vmul.f32 %v884_v32, %v1987_v22  ;;  %869 = vst [vmem:[%s2078_s7 + $0x18] sm:$0xff] %v1156_v37  ;;  %v885_v12 = vsub.f32 1.0, %v1156_v37 }
 0x184   : > { %v1414_v15 = vpop.eup %1413  ;;  %1429 = vrcp.f32 %v746_v6  ;;  %v747_v24 = vadd.f32 1.0, %v1412_v38  ;;  %v898_v35 = vmul.f32 %v882_v33, %v1981_v16  ;;  %v1154_v36 = vsel %vm819_vm3, 1.0, %v1664_v62 }
 0x185   : > { %v1416_v39 = vpop.eup %1415  ;;  %v808_v23 = vsub.f32 %v2000_v19, %v1414_v15  ;;  %1431 = vrcp.f32 %v749_v10  ;;  %v916_v41 = vadd.f32 %v2003_v46, %v900_v11  ;;  %v901_v42 = vmul.f32 %v885_v12, %v1990_v29  ;;  %867 = vst [vmem:[%s2078_s7 + $0x8] sm:$0xff] %v1154_v36 }
 0x186   : > { %v1418_v22 = vpop.eup %1417  ;;  %v806_v7 = vsub.f32 %v1993_v30, %v1416_v39  ;;  %1433 = vrcp.f32 %v747_v24  ;;  %v914_v43 = vadd.f32 %v2006_v51, %v898_v35  ;;  %v883_v45 = vsub.f32 1.0, %v1154_v36 }
 0x187   : > { %v1420_v16 = vpop.eup %1419  ;;  %vm824_vm4 = vcmp.ge.f32.partialorder %v808_v23, 0.0  ;;  %v809_v47 = vsub.f32 %v2009_v52, %v1418_v22  ;;  %932 = vst [vmem:[%s2096_s17 + $0x10] sm:$0xff] %v916_v41  ;;  %v917_v29 = vadd.f32 %v2012_v54, %v901_v42  ;;  %1435 = vpow2.f32 %v1150_v53 }
 0x188   : > { %v1422_v46 = vpop.eup %1421  ;;  %vm2100_vm5 = vcmp.ge.f32.partialorder %v806_v7, 0.0  ;;  %v807_v51 = vsub.f32 %v1996_v8, %v1420_v16  ;;  %930 = vst [vmem:[%s2096_s17] sm:$0xff] %v914_v43  ;;  %v899_v25 = vmul.f32 %v883_v45, %v1984_v17  ;;  %v1159_v58 = vsel %vm824_vm4, 1.0, %v1664_v62 }
 0x189   : > { %v1424_v61 = vpop.eup %1423  ;;  %vm2108_vm6 = vcmp.ge.f32.partialorder %v809_v47, 0.0  ;;  %933 = vst [vmem:[%s2096_s17 + $0x18] sm:$0xff] %v917_v29  ;;  %v752_v54 = vadd.f32 1.0, %v1422_v46  ;;  %872 = vst [vmem:[%s2078_s7 + $0x30] sm:$0xff] %v1159_v58  ;;  %v888_v53 = vsub.f32 1.0, %v1159_v58  ;;  %1437 = vtanh.f32 %v2038_v3 }
 0x18a   : > { %v1426_v31 = vpop.eup %1425  ;;  %vm823_vm7 = vcmp.ge.f32.partialorder %v807_v51, 0.0  ;;  %v915_v2 = vadd.f32 %v2020_v59, %v899_v25  ;;  %v750_v17 = vadd.f32 1.0, %v1424_v61  ;;  %v1157_v32 = vsel %vm2100_vm5, 1.0, %v1664_v62 }
 0x18b   : > { %1439 = vrcp.f32 %v752_v54  ;;  %v753_v4 = vadd.f32 1.0, %v1426_v31  ;;  %v904_v5 = vmul.f32 %v888_v53, %v2000_v19  ;;  %870 = vst [vmem:[%s2078_s7 + $0x20] sm:$0xff] %v1157_v32  ;;  %v886_v6 = vsub.f32 1.0, %v1157_v32 }
 0x18c   : > { %931 = vst [vmem:[%s2096_s17 + $0x8] sm:$0xff] %v915_v2  ;;  %1441 = vrcp.f32 %v750_v17  ;;  %v1160_v3 = vsel %vm2108_vm6, 1.0, %v1664_v62  ;;  %v1158_v59 = vsel %vm823_vm7, 1.0, %v1664_v62  ;;  %v500_v33 = vadd.f32 %v2059_v44, %v1968_v49 }
 0x18d   : > { %v1428_v37 = vpop.eup %1427  ;;  %1443 = vrcp.f32 %v753_v4  ;;  %v920_v38 = vadd.f32 %v2048_v14, %v904_v5  ;;  %v902_v19 = vmul.f32 %v886_v6, %v1993_v30  ;;  %873 = vst [vmem:[%s2078_s7 + $0x38] sm:$0xff] %v1160_v3  ;;  %v889_v10 = vsub.f32 1.0, %v1160_v3  ;;  %871 = vst [vmem:[%s2078_s7 + $0x28] sm:$0xff] %v1158_v59 }
 0x18e   : > { %v1430_v11 = vpop.eup %1429  ;;  %v812_v12 = vsub.f32 %v2023_v26, %v1428_v37  ;;  %1445 = vtanh.f32 %v2042_v9  ;;  %v887_v15 = vsub.f32 1.0, %v1158_v59  ;;  %v492_v24 = vadd.f32 %v1968_v49, %v2068_v48 }
 0x18f   : > { %v1432_v35 = vpop.eup %1431  ;;  %v810_v44 = vsub.f32 %v2015_v55, %v1430_v11  ;;  %936 = vst [vmem:[%s2096_s17 + $0x30] sm:$0xff] %v920_v38  ;;  %v905_v14 = vmul.f32 %v889_v10, %v2009_v52  ;;  %1447 = vtanh.f32 %v2046_v13  ;;  %v503_v30 = vadd.f32 %v2071_v57, %v1968_v49 }
 0x190   : > { %v1434_v36 = vpop.eup %1433  ;;  %vm828_vm8 = vcmp.ge.f32.partialorder %v812_v12, 0.0  ;;  %v813_v9 = vsub.f32 %v2026_v60, %v1432_v35  ;;  %v903_v39 = vmul.f32 %v887_v15, %v1996_v8  ;;  %1449 = vtanh.f32 %v2053_v18 }
 0x191   : > { %v1436_v48 = vpop.eup %1435  ;;  %vm826_vm9 = vcmp.ge.f32.partialorder %v810_v44, 0.0  ;;  %v811_v23 = vsub.f32 %v2018_v56, %v1434_v36  ;;  %v1163_v52 = vsel %vm828_vm8, 1.0, %v1664_v62  ;;  %1451 = vtanh.f32 %v2057_v20 }
 0x192   : > { %vm829_vm10 = vcmp.ge.f32.partialorder %v813_v9, 0.0  ;;  %v751_v13 = vadd.f32 1.0, %v1436_v48  ;;  %876 = vst [vmem:[%s2078_s7 + $0x50] sm:$0xff] %v1163_v52  ;;  %v892_v57 = vsub.f32 1.0, %v1163_v52  ;;  %v1161_v41 = vsel %vm826_vm9, 1.0, %v1664_v62 }
 0x193   : > { %v1438_v42 = vpop.eup %1437  ;;  %vm827_vm11 = vcmp.ge.f32.partialorder %v811_v23, 0.0  ;;  %874 = vst [vmem:[%s2078_s7 + $0x40] sm:$0xff] %v1161_v41  ;;  %v890_v8 = vsub.f32 1.0, %v1161_v41  ;;  %1453 = vtanh.f32 %v2063_v21  ;;  %v1164_v18 = vsel %vm829_vm10, 1.0, %v1664_v62 }
 0x194   : > { %1455 = vrcp.f32 %v751_v13  ;;  %v918_v22 = vadd.f32 %v1438_v42, %v902_v19  ;;  %v908_v20 = vmul.f32 %v892_v57, %v2023_v26  ;;  %877 = vst [vmem:[%s2078_s7 + $0x58] sm:$0xff] %v1164_v18  ;;  %v893_v7 = vsub.f32 1.0, %v1164_v18 }
 0x195   : > { %v1440_v43 = vpop.eup %1439  ;;  %v906_v45 = vmul.f32 %v890_v8, %v2015_v55  ;;  %1457 = vtanh.f32 %v2066_v40  ;;  %v1162_v16 = vsel %vm827_vm11, 1.0, %v1664_v62  ;;  %v495_v55 = vadd.f32 %v1968_v49, %v2075_v1 }
 0x196   : > { %v1442_v47 = vpop.eup %1441  ;;  %v816_v29 = vsub.f32 %v2032_v28, %v1440_v43  ;;  %934 = vst [vmem:[%s2096_s17 + $0x20] sm:$0xff] %v918_v22  ;;  %v909_v21 = vmul.f32 %v893_v7, %v2026_v60  ;;  %875 = vst [vmem:[%s2078_s7 + $0x48] sm:$0xff] %v1162_v16  ;;  %v891_v46 = vsub.f32 1.0, %v1162_v16  ;;  %1459 = vtanh.f32 %v500_v33 }
 0x197   : > { %v1444_v50 = vpop.eup %1443  ;;  %v814_v26 = vsub.f32 %v2029_v27, %v1442_v47  ;;  %1461 = vtanh.f32 %v492_v24 }
 0x198   : > { %v1446_v40 = vpop.eup %1445  ;;  %vm832_vm12 = vcmp.ge.f32.partialorder %v816_v29, 0.0  ;;  %v817_v51 = vsub.f32 %v2035_v0, %v1444_v50  ;;  %v907_v25 = vmul.f32 %v891_v46, %v2018_v56  ;;  %1463 = vtanh.f32 %v503_v30 }
 0x199   : > { %v1448_v60 = vpop.eup %1447  ;;  %vm830_vm13 = vcmp.ge.f32.partialorder %v814_v26, 0.0  ;;  %v921_v58 = vadd.f32 %v1446_v40, %v905_v14  ;;  %v1167_v61 = vsel %vm832_vm12, 1.0, %v1664_v62  ;;  %v2171_v56 = vmul.f32 0.5, %v1943_v34 }
 0x19a   : > { %v1450_v63 = vpop.eup %1449  ;;  %vm833_vm14 = vcmp.ge.f32.partialorder %v817_v51, 0.0  ;;  %v919_v54 = vadd.f32 %v1448_v60, %v903_v39  ;;  %880 = vst [vmem:[%s2078_s7 + $0x70] sm:$0xff] %v1167_v61  ;;  %v896_v49 = vsub.f32 1.0, %v1167_v61  ;;  %v1165_v1 = vsel %vm830_vm13, 1.0, %v1664_v62 }
 0x19b   : > { %v1452_v53 = vpop.eup %1451  ;;  %937 = vst [vmem:[%s2096_s17 + $0x38] sm:$0xff] %v921_v58  ;;  %v924_v31 = vadd.f32 %v1450_v63, %v908_v20  ;;  %878 = vst [vmem:[%s2078_s7 + $0x60] sm:$0xff] %v1165_v1  ;;  %v894_v2 = vsub.f32 1.0, %v1165_v1  ;;  %v1168_v17 = vsel %vm833_vm14, 1.0, %v1664_v62  ;;  %1465 = vtanh.f32 %v495_v55 }
 0x19c   : > { %935 = vst [vmem:[%s2096_s17 + $0x28] sm:$0xff] %v919_v54  ;;  %v922_v32 = vadd.f32 %v1452_v53, %v906_v45  ;;  %v912_v4 = vmul.f32 %v896_v49, %v2032_v28  ;;  %881 = vst [vmem:[%s2078_s7 + $0x78] sm:$0xff] %v1168_v17  ;;  %v897_v5 = vsub.f32 1.0, %v1168_v17 }
 0x19d   : > { %v1454_v6 = vpop.eup %1453  ;;  %940 = vst [vmem:[%s2096_s17 + $0x50] sm:$0xff] %v924_v31  ;;  %v910_v34 = vmul.f32 %v894_v2, %v2029_v27 }
 0x19e   : > { %v1456_v3 = vpop.eup %1455  ;;  %938 = vst [vmem:[%s2096_s17 + $0x40] sm:$0xff] %v922_v32  ;;  %v925_v59 = vadd.f32 %v1454_v6, %v909_v21  ;;  %v913_v33 = vmul.f32 %v897_v5, %v2035_v0 }
 0x19f   : > { %v1458_v37 = vpop.eup %1457  ;;  %v815_v28 = vsub.f32 %v2171_v56, %v1456_v3 }
 0x1a0   : > { %v1460_v38 = vpop.eup %1459  ;;  %941 = vst [vmem:[%s2096_s17 + $0x58] sm:$0xff] %v925_v59  ;;  %v923_v19 = vadd.f32 %v1458_v37, %v907_v25 }
 0x1a1   : > { %v1462_v27 = vpop.eup %1461  ;;  %vm831_vm15 = vcmp.ge.f32.partialorder %v815_v28, 0.0  ;;  %v928_v0 = vadd.f32 %v1460_v38, %v912_v4 }
 0x1a2   : > { %v1464_v10 = vpop.eup %1463  ;;  %939 = vst [vmem:[%s2096_s17 + $0x48] sm:$0xff] %v923_v19  ;;  %v926_v11 = vadd.f32 %v1462_v27, %v910_v34  ;;  %v1166_v12 = vsel %vm831_vm15, 1.0, %v1664_v62 }
 0x1a3   : > { %944 = vst [vmem:[%s2096_s17 + $0x70] sm:$0xff] %v928_v0  ;;  %v929_v15 = vadd.f32 %v1464_v10, %v913_v33  ;;  %879 = vst [vmem:[%s2078_s7 + $0x68] sm:$0xff] %v1166_v12  ;;  %v895_v24 = vsub.f32 1.0, %v1166_v12 }
 0x1a4   : > { %942 = vst [vmem:[%s2096_s17 + $0x60] sm:$0xff] %v926_v11 }
 0x1a5   : > { %1566 = shalt.err (!%p1563_p2)
}
 0x1a6   : > { %s1567_s16 = scalar_lea.hbm %s2192_s30, 2048  ;;  %s1571_s18 = scalar_lea.hbm %s2293_s5, 4096 }
 0x1a7   : > { %p1568_p13 = scmp.ne.s32.totalorder %s2192_s30, %s1567_s16  ;;  %p1572_p4 = scmp.lt.u32.totalorder %s2192_s30, %s2293_s5 }
 0x1a8   : > { %p1573_p5 = scmp.lt.u32.totalorder %s1571_s18, %s1567_s16  ;;  %p1575_p11 = scmp.lt.u32.totalorder %s1567_s16, %s2192_s30 }
 0x1a9   : > { %p1569_p6 = pnand %p1568_p13, %p2312_p0 }
 0x1aa   : > { %p1574_p8 = por %p1573_p5, %p1572_p4 }
 0x1ab   : > { %p1570_p10 = pneg %p1569_p6 }
 0x1ac   : > { %p1576_p1 = por %p1575_p11, %p1574_p8 }
 0x1ae   : > { %p1577_p3 = pnand %p1576_p1, %p1570_p10 }
 0x1b0   : > { %1580 = shalt.err (!%p1577_p3)
}
 0x1b1   : > { %s1666_s12 = smov 128   ;;  %s1667_s14 = smov 8   ;;  %945 = vst [vmem:[%s2096_s17 + $0x78] sm:$0xff] %v929_v15  ;;  %v911_v62 = vmul.f32 %v895_v24, %v2171_v56  ;;  %v1466_v35 = vpop.eup %1465 }
 0x1b2   : > { %1286 = dma.vmem_to_hbm [thread:$0]  (%p2312_p0), %s2194_s15, 2048, %s2192_s30, %s947_s19, %s1666_s12, %s1666_s12, %s1667_s14  }
 0x1b3   : > { %v927_v44 = vadd.f32 %v1466_v35, %v911_v62  ;;  %s2236_s8 = scalar_lea.hbm %s2294_s6, %s1178_s20  ;;  %s952_s18 = scalar_lea.sflag [#allocation10], %s1876_s13 }
 0x1b4   : > { %s1581_s15 = scalar_lea.vmem %s2240_s10, 2048  ;;  %s1668_s30 = smov [#allocation9]  }
 0x1b5   : > { %943 = vst [vmem:[%s2096_s17 + $0x68] sm:$0xff] %v927_v44  ;;  %p1582_p7 = scmp.ne.s32.totalorder %s2240_s10, %s1581_s15  ;;  %s1585_s25 = sshll.u32 %s1668_s30, 4  ;;  %s1586_s25 = int_to_ptr.vmem [resolvable:$false] %s1585_s25 }
 0x1b6   : > { %s1587_s19 = scalar_lea.vmem %s1586_s25, 4096  ;;  %p1588_p2 = scmp.lt.s32.totalorder %s2240_s10, %s1586_s25 }
 0x1b7   : > { %p1583_p9 = pnand %p1582_p7, %p2312_p0  ;;  %p1589_p13 = scmp.lt.s32.totalorder %s1587_s19, %s1581_s15 }
 0x1b9   : > { %p1584_p12 = pneg %p1583_p9  ;;  %p1590_p6 = por %p1589_p13, %p1588_p2 }
 0x1bb   : > { %p1591_p10 = pnand %p1590_p6, %p1584_p12 }
 0x1bd   : > { %1594 = shalt.err (!%p1591_p10)
}
 0x1be   : > { %s1595_s17 = scalar_lea.hbm %s2236_s8, 2048  ;;  %s1599_s29 = scalar_lea.hbm %s2294_s6, 4096 }
 0x1bf   : > { %p1596_p4 = scmp.ne.s32.totalorder %s2236_s8, %s1595_s17  ;;  %p1600_p11 = scmp.lt.u32.totalorder %s2236_s8, %s2294_s6 }
 0x1c0   : > { %p1601_p1 = scmp.lt.u32.totalorder %s1599_s29, %s1595_s17  ;;  %p1603_p7 = scmp.lt.u32.totalorder %s1595_s17, %s2236_s8 }
 0x1c1   : > { %p1597_p5 = pnand %p1596_p4, %p2312_p0 }
 0x1c2   : > { %p1602_p3 = por %p1601_p1, %p1600_p11 }
 0x1c3   : > { %p1598_p8 = pneg %p1597_p5 }
 0x1c4   : > { %p1604_p9 = por %p1603_p7, %p1602_p3 }
 0x1c6   : > { %p1605_p12 = pnand %p1604_p9, %p1598_p8 }
 0x1c8   : > { %1608 = shalt.err (!%p1605_p12)
}
 0x1c9   : > { %1287 = dma.vmem_to_hbm [thread:$0]  (%p2312_p0), %s2240_s10, 2048, %s2236_s8, %s952_s18, %s1666_s12, %s1666_s12, %s1667_s14  }
 0x1ca PF: > { %s996_s15 = sand.u32 1, %s1643_s21   ;;  %p2313_p2 = scmp.ne.s32.totalorder %s2299_s28, 0 }
 0x1cb   : > { %p2314_p13 = scmp.ge.s32.totalorder %s1655_s24, 2  ;;  %s997_s30 = scalar_lea.sflag [#allocation4], %s996_s15 }
 0x1cd   : > { %p1302_p6 = pnand %p2314_p13, %p2313_p2 }
 0x1cf   : > { %1634 = dma.done.wait (!%p1302_p6), %s997_s30, 2048  }
 0x1d0   : > { %1636 = vsyncadd (!%p1302_p6), %s997_s30, 4294965248  ;;  %s1006_s9 = scalar_lea.sflag [#allocation10], %s996_s15 }
 0x1d1   : > { %1638 = dma.done.wait (!%p1302_p6), %s1006_s9, 2048  }
 0x1d2   : > { %1640 = vsyncadd (!%p1302_p6), %s1006_s9, 4294965248  ;;  %p24_p0 = scmp.ge.s32.totalorder %s1814_s26, 4   ;;  %s2315_s21 = smov %s1647_s22 }
 0x1d3   : > { %s2316_s22 = smov %s1651_s23  ;;  %s2317_s23 = smov %s1830_s11 }
 0x1d4   : > { %s2318_s24 = smov %s1814_s26  ;;  %26 = sbr.rel (!%p24_p0) target bundleno = 8 (0x8), region = 110 }
 0x1db   :  { %1011 = vsyncpa [#allocation3], 1 }
 0x1dc   :  { %1013 = vsyncpa [#allocation3 + $0x1], 1 }
 0x1dd   :  { %1014 = vsyncpa [#allocation6], 1 }
 0x1de   :  { %1015 = vsyncpa [#allocation4], 1 }
 0x1df   :  { %1017 = vsyncpa [#allocation4 + $0x1], 1 }
 0x1e0   :  { %1018 = vsyncpa [#allocation10], 1 }
 0x1e1   :  { %1020 = vsyncpa [#allocation10 + $0x1], 1 }

</bundles_post_ra>
